<compile_context>
chip_gen: v5e
topology: v5e:2x2
jax: 0.10.0
libtpu: 0.0.40
codegen_flags: <defaults>
</compile_context>

<pallas_src>
import functools

import jax
import jax.numpy as jnp
from jax.experimental import pallas as pl
from jax.experimental.pallas import tpu as pltpu


_VMEM_LIMIT_BYTES = 32 * 1024 * 1024   # safe on v5e/v6e (128 MiB) and v7x (64 MiB physical)
_MIX_BLOCK_BYTES = 2 * 1024 * 1024     # per-stream mix block: 3 streams x 2 buffers ~ 12 MiB
_RMS_BLOCK_BYTES = 256 * 1024          # per-stream RMS block (+ 2 block-sized f32 scratch)
_LANES = 128


def _sublane_quantum(dtype):
    """Minimum sublane multiple for a dense packed tile of this dtype."""
    return {4: 8, 2: 16, 1: 32}.get(jnp.dtype(dtype).itemsize, 8)


def _pick_block_rows(total_rows, sub, bytes_per_row, max_bytes, min_steps=1):
    """Largest multiple of `sub` dividing total_rows, fitting max_bytes, leaving >= min_steps blocks."""
    best_fit, best_steps = None, None
    cand = sub
    while cand <= total_rows:
        if total_rows % cand == 0 and cand * bytes_per_row <= max_bytes:
            best_fit = cand
            if total_rows // cand >= min_steps:
                best_steps = cand
        cand += sub
    return best_steps or best_fit or sub


# -----------------------------------------------------------------------------
# Kernel 1: sum-of-squares over the reference channel (signal & dithered noise).
# -----------------------------------------------------------------------------
def _rms_kernel(x_ref, n_ref, d_ref, sig_out, noi_out, acc_sig, acc_noi, *, zero_noise):
    i = pl.program_id(0)

    @pl.when(i == 0)
    def _():
        acc_sig[...] = jnp.zeros_like(acc_sig)
        acc_noi[...] = jnp.zeros_like(acc_noi)

    x = x_ref[...].astype(jnp.float32)
    d = jnp.float32(1e-9) * d_ref[...]
    n = d if zero_noise else n_ref[...].astype(jnp.float32) + d

    # Block-shaped elementwise partials (pure VPU FMA); one cross-lane reduce at the end.
    acc_sig[...] += x * x
    acc_noi[...] += n * n

    @pl.when(i == pl.num_programs(0) - 1)
    def _():
        sig_out[...] = jnp.sum(jnp.sum(acc_sig[...], axis=1, keepdims=True),
                               axis=0, keepdims=True)
        noi_out[...] = jnp.sum(jnp.sum(acc_noi[...], axis=1, keepdims=True),
                               axis=0, keepdims=True)


def ref_channel_sumsq(xf, nf, dither, *, rc_block_start, n_blocks, block_rows, zero_noise):
    """Returns (sum(x[rc]^2), sum((noise[rc] + 1e-9*dither)^2)) over the time axis."""
    blk_full = pl.BlockSpec((block_rows, _LANES), lambda i: (rc_block_start + i, 0))
    blk_dith = pl.BlockSpec((block_rows, _LANES), lambda i: (i, 0))
    out_spec = pl.BlockSpec((1, 1), lambda i: (0, 0))
    kernel = functools.partial(_rms_kernel, zero_noise=zero_noise)
    sig_ss, noi_ss = pl.pallas_call(
        kernel,
        out_shape=(jax.ShapeDtypeStruct((1, 1), jnp.float32),
                   jax.ShapeDtypeStruct((1, 1), jnp.float32)),
        grid_spec=pltpu.PrefetchScalarGridSpec(
            num_scalar_prefetch=0,
            grid=(n_blocks,),
            in_specs=[blk_full, blk_full, blk_dith],
            out_specs=(out_spec, out_spec),
            scratch_shapes=[pltpu.VMEM((block_rows, _LANES), jnp.float32),
                            pltpu.VMEM((block_rows, _LANES), jnp.float32)]),
        compiler_params=pltpu.CompilerParams(
            dimension_semantics=("arbitrary",),
            vmem_limit_bytes=_VMEM_LIMIT_BYTES),
    )(xf, nf, dither)
    return sig_ss[0, 0], noi_ss[0, 0]


# -----------------------------------------------------------------------------
# Kernel 2: elementwise mix  out = x + noise * scale   (optional in-kernel channel zeroing)
# -----------------------------------------------------------------------------
def _mix_kernel(scale_ref, x_ref, n_ref, o_ref, *, ignore_channel, rows_per_ch, block_rows):
    x = x_ref[...].astype(jnp.float32)
    n = n_ref[...].astype(jnp.float32)
    if ignore_channel is not None:
        # Per-row channel id for this (possibly channel-spanning) block.
        row = (pl.program_id(0) * block_rows
               + jax.lax.broadcasted_iota(jnp.int32, x.shape, 0))
        n = jnp.where(row // rows_per_ch == ignore_channel, jnp.float32(0.0), n)
    o_ref[...] = (x + n * scale_ref[0]).astype(o_ref.dtype)


def mix_noise(xf, nf, scale, *, block_rows, rows_per_ch, ignore_channel):
    total_rows = xf.shape[0]
    blk = pl.BlockSpec((block_rows, _LANES), lambda i, s: (i, 0))
    kernel = functools.partial(_mix_kernel, ignore_channel=ignore_channel,
                               rows_per_ch=rows_per_ch, block_rows=block_rows)
    return pl.pallas_call(
        kernel,
        out_shape=jax.ShapeDtypeStruct(xf.shape, xf.dtype),
        grid_spec=pltpu.PrefetchScalarGridSpec(
            num_scalar_prefetch=1,              # scale lands in SMEM
            grid=(total_rows // block_rows,),
            in_specs=[blk, blk],
            out_specs=blk),
        compiler_params=pltpu.CompilerParams(
            dimension_semantics=("parallel",),
            vmem_limit_bytes=_VMEM_LIMIT_BYTES),
    )(scale, xf, nf)


# -----------------------------------------------------------------------------
# NoiseTransform wrapper (JAX glue around the Pallas hot paths).
# -----------------------------------------------------------------------------
class NoiseTransformPallas:
    def __init__(self, reference_channel_target=0, ignore_channel=None,
                 snr_db=(0.0, 30.0),
                 mix_block_bytes=_MIX_BLOCK_BYTES, rms_block_bytes=_RMS_BLOCK_BYTES):
        self.reference_channel_target = reference_channel_target
        self.ignore_channel = ignore_channel
        if isinstance(snr_db, (tuple, list)):
            assert len(snr_db) == 2
        self.snr_db = snr_db
        self.mix_block_bytes = mix_block_bytes
        self.rms_block_bytes = rms_block_bytes
        # TODO(synk): CSV file-list reading / torchaudio loading / resampling in get_noise()
        # has no Pallas equivalent; `noise` is passed in as an array.

    def set_fixed_snr(self, snr_db):
        self.snr_db = snr_db

    def get_desired_snr_db(self, key):
        if isinstance(self.snr_db, (tuple, list)):
            low, high = self.snr_db
            return (high - low) * jax.random.uniform(key, (), jnp.float32) + low
        return jnp.float32(self.snr_db)

    def __call__(self, x, noise, key):
        c, t = x.shape
        key_dither, key_snr = jax.random.split(key)

        itemsize = jnp.dtype(x.dtype).itemsize
        sub = _sublane_quantum(x.dtype)
        quantum = sub * _LANES
        t_pad = (-(-t // quantum)) * quantum
        rows_per_ch = t_pad // _LANES
        total_rows = c * rows_per_ch
        bytes_per_row = _LANES * itemsize

        if t_pad != t:   # one-off tail pad; padded zeros are inert in both kernels
            x = jnp.pad(x, ((0, 0), (0, t_pad - t)))
            noise = jnp.pad(noise, ((0, 0), (0, t_pad - t)))

        # Free row-major reshape to a sublane/lane-dense 2D view; every (rows, 128) block
        # spans the full lane width, so each DMA tile is fully contiguous in HBM.
        xf = x.reshape(total_rows, _LANES)
        nf = noise.reshape(total_rows, _LANES)

        rc = self.reference_channel_target

        # 1e-9 dither for the SNR denominator (silent-noise guard), reference channel only.
        # TODO(synk): the PyTorch module dithers every noise channel before mixing; outside
        # the RMS denominator it only perturbs the output by <= 1e-9*scale, so it is dropped.
        dither = jax.random.normal(key_dither, (t_pad,), jnp.float32)
        if t_pad != t:
            dither = jnp.where(jnp.arange(t_pad) < t, dither, 0.0)
        dither = dither.reshape(rows_per_ch, _LANES)

        # --- Pass 1: reference-channel sum of squares (reduction kernel) ----------------
        rms_rows = _pick_block_rows(rows_per_ch, sub, bytes_per_row,
                                    self.rms_block_bytes, min_steps=1)
        blocks_per_ch = rows_per_ch // rms_rows
        zero_noise = (self.ignore_channel is not None and self.ignore_channel == rc)
        sig_ss, noi_ss = ref_channel_sumsq(
            xf, nf, dither,
            rc_block_start=rc * blocks_per_ch, n_blocks=blocks_per_ch,
            block_rows=rms_rows, zero_noise=zero_noise)

        rms_sig = jnp.sqrt(sig_ss / t)
        rms_noi = jnp.sqrt(noi_ss / t)
        # NOTE: if the reference noise channel is silent (or equals ignore_channel), rms_noi
        # collapses to ~1e-9 (dither only) and noise_scale blows up -- matches PyTorch.
        curr_snr_db = 20.0 * jnp.log10(rms_sig / rms_noi)

        desired_snr_db = self.get_desired_snr_db(key_snr)
        noise_scale = 10.0 ** ((curr_snr_db - desired_snr_db) / 20.0)
        noise_scale = jnp.reshape(noise_scale, (1,)).astype(jnp.float32)

        # --- Pass 2: elementwise mix (HBM-bandwidth bound) -------------------------------
        mix_rows = _pick_block_rows(total_rows, sub, bytes_per_row,
                                    self.mix_block_bytes, min_steps=2)
        out = mix_noise(xf, nf, noise_scale, block_rows=mix_rows,
                        rows_per_ch=rows_per_ch, ignore_channel=self.ignore_channel)
        return out.reshape(c, t_pad)[:, :t]


if __name__ == "__main__":
    key = jax.random.PRNGKey(0)
    k_x, k_noise, k_fwd = jax.random.split(key, 3)

    # 4-channel, 4 s @ 16 kHz clip (module defaults); (C, T) layout, non-tile-aligned T.
    C, T = 4, 64000
    x = jax.random.normal(k_x, (C, T), jnp.float32)
    noise = 0.3 * jax.random.normal(k_noise, (C, T), jnp.float32)

    transform = NoiseTransformPallas(reference_channel_target=0,
                                     ignore_channel=None, snr_db=(0.0, 30.0))
    out = jax.block_until_ready(transform(x, noise, k_fwd))
    assert out.shape == (C, T) and out.dtype == x.dtype

    # Pure-JAX reference (dither-free: the 1e-9 dither only guards a silent noise channel).
    _, k_snr = jax.random.split(k_fwd)
    desired = transform.get_desired_snr_db(k_snr)
    rms_sig = jnp.sqrt(jnp.mean(x[0] ** 2))
    rms_noi = jnp.sqrt(jnp.mean(noise[0] ** 2))
    curr_snr_db = 20.0 * jnp.log10(rms_sig / rms_noi)
    scale = 10.0 ** ((curr_snr_db - desired) / 20.0)
    ref = x + noise * scale
    err = float(jnp.max(jnp.abs(out - ref)))
    assert jnp.allclose(out, ref, rtol=1e-3, atol=1e-4), f"max abs err {err:.3e}"

    # ignore_channel path (in-kernel masking, fixed SNR).
    transform_ig = NoiseTransformPallas(reference_channel_target=0,
                                        ignore_channel=2, snr_db=10.0)
    out_ig = jax.block_until_ready(transform_ig(x, noise, k_fwd))
    noise_ig = noise.at[2].set(0.0)
    scale_ig = 10.0 ** ((curr_snr_db - 10.0) / 20.0)
    ref_ig = x + noise_ig * scale_ig
    err_ig = float(jnp.max(jnp.abs(out_ig - ref_ig)))
    assert jnp.allclose(out_ig, ref_ig, rtol=1e-3, atol=1e-4), f"max abs err {err_ig:.3e}"

    print("KERNEL_OK")
</pallas_src>

<mosaic_0001>
module attributes {stable_mosaic.version = 11 : i64} {
  func.func @_rms_kernel(%arg0: i32, %arg1: memref<504x128xf32, #tpu.memory_space<vmem>>, %arg2: memref<504x128xf32, #tpu.memory_space<vmem>>, %arg3: memref<504x128xf32, #tpu.memory_space<vmem>>, %arg4: memref<1x1xf32, #tpu.memory_space<vmem>>, %arg5: memref<1x1xf32, #tpu.memory_space<vmem>>, %arg6: memref<504x128xf32, #tpu.memory_space<vmem>>, %arg7: memref<504x128xf32, #tpu.memory_space<vmem>>) attributes {dimension_semantics = [#tpu.dimension_semantics<arbitrary>], iteration_bounds = array<i64: 1>, scalar_prefetch = 0 : i64, scratch_operands = 2 : i64, tpu.core_type = #tpu.core_type<tc>, window_params = [{transform_indices = @transform_0, window_bounds = array<i64: 504, 128>}, {transform_indices = @transform_1, window_bounds = array<i64: 504, 128>}, {transform_indices = @transform_2, window_bounds = array<i64: 504, 128>}, {pipeline_mode = #tpu.pipeline_mode<synchronous>, transform_indices = @transform_3, window_bounds = array<i64: 1, 1>}, {pipeline_mode = #tpu.pipeline_mode<synchronous>, transform_indices = @transform_4, window_bounds = array<i64: 1, 1>}]} {
    %c0_i32 = arith.constant 0 : i32
    %0 = arith.cmpi eq, %arg0, %c0_i32 : i32
    %1 = arith.extui %0 : i1 to i32
    %c0_i32_0 = arith.constant 0 : i32
    %2 = arith.cmpi ne, %1, %c0_i32_0 : i32
    scf.if %2 {
      %cst_16 = arith.constant 0.000000e+00 : f32
      %20 = vector.broadcast %cst_16 : f32 to vector<504x128xf32>
      %c0_17 = arith.constant 0 : index
      %c0_18 = arith.constant 0 : index
      %21 = vector.load %arg6[%c0_17, %c0_18] : memref<504x128xf32, #tpu.memory_space<vmem>>, vector<504x128xf32>
      tpu.vector_store %arg6[%c0_17, %c0_18], %20 {strides = array<i32>} : memref<504x128xf32, #tpu.memory_space<vmem>>, vector<504x128xf32>,
      %cst_19 = arith.constant 0.000000e+00 : f32
      %22 = vector.broadcast %cst_19 : f32 to vector<504x128xf32>
      %c0_20 = arith.constant 0 : index
      %c0_21 = arith.constant 0 : index
      %23 = vector.load %arg7[%c0_20, %c0_21] : memref<504x128xf32, #tpu.memory_space<vmem>>, vector<504x128xf32>
      tpu.vector_store %arg7[%c0_20, %c0_21], %22 {strides = array<i32>} : memref<504x128xf32, #tpu.memory_space<vmem>>, vector<504x128xf32>,
    } else {
    }
    %c0 = arith.constant 0 : index
    %c0_1 = arith.constant 0 : index
    %3 = vector.load %arg1[%c0, %c0_1] : memref<504x128xf32, #tpu.memory_space<vmem>>, vector<504x128xf32>
    %c0_2 = arith.constant 0 : index
    %c0_3 = arith.constant 0 : index
    %4 = vector.load %arg3[%c0_2, %c0_3] : memref<504x128xf32, #tpu.memory_space<vmem>>, vector<504x128xf32>
    %cst = arith.constant 9.99999971E-10 : f32
    %5 = vector.broadcast %cst : f32 to vector<504x128xf32>
    %6 = arith.mulf %5, %4 : vector<504x128xf32>
    %c0_4 = arith.constant 0 : index
    %c0_5 = arith.constant 0 : index
    %7 = vector.load %arg2[%c0_4, %c0_5] : memref<504x128xf32, #tpu.memory_space<vmem>>, vector<504x128xf32>
    %8 = arith.addf %7, %6 : vector<504x128xf32>
    %c0_6 = arith.constant 0 : index
    %c0_7 = arith.constant 0 : index
    %9 = vector.load %arg6[%c0_6, %c0_7] : memref<504x128xf32, #tpu.memory_space<vmem>>, vector<504x128xf32>
    %10 = arith.mulf %3, %3 : vector<504x128xf32>
    %11 = arith.addf %9, %10 : vector<504x128xf32>
    %c0_8 = arith.constant 0 : index
    %c0_9 = arith.constant 0 : index
    %12 = vector.load %arg6[%c0_8, %c0_9] : memref<504x128xf32, #tpu.memory_space<vmem>>, vector<504x128xf32>
    tpu.vector_store %arg6[%c0_8, %c0_9], %11 {strides = array<i32>} : memref<504x128xf32, #tpu.memory_space<vmem>>, vector<504x128xf32>,
    %c0_10 = arith.constant 0 : index
    %c0_11 = arith.constant 0 : index
    %13 = vector.load %arg7[%c0_10, %c0_11] : memref<504x128xf32, #tpu.memory_space<vmem>>, vector<504x128xf32>
    %14 = arith.mulf %8, %8 : vector<504x128xf32>
    %15 = arith.addf %13, %14 : vector<504x128xf32>
    %c0_12 = arith.constant 0 : index
    %c0_13 = arith.constant 0 : index
    %16 = vector.load %arg7[%c0_12, %c0_13] : memref<504x128xf32, #tpu.memory_space<vmem>>, vector<504x128xf32>
    tpu.vector_store %arg7[%c0_12, %c0_13], %15 {strides = array<i32>} : memref<504x128xf32, #tpu.memory_space<vmem>>, vector<504x128xf32>,
    %c0_i32_14 = arith.constant 0 : i32
    %17 = arith.cmpi eq, %arg0, %c0_i32_14 : i32
    %18 = arith.extui %17 : i1 to i32
    %c0_i32_15 = arith.constant 0 : i32
    %19 = arith.cmpi ne, %18, %c0_i32_15 : i32
    scf.if %19 {
      %c0_16 = arith.constant 0 : index
      %c0_17 = arith.constant 0 : index
      %20 = vector.load %arg6[%c0_16, %c0_17] : memref<504x128xf32, #tpu.memory_space<vmem>>, vector<504x128xf32>
      %cst_18 = arith.constant dense<0.000000e+00> : vector<504xf32>
      %21 = vector.multi_reduction <add>, %20, %cst_18 [1] : vector<504x128xf32> to vector<504xf32>
      %22 = vector.shape_cast %21 : vector<504xf32> to vector<504x1xf32>
      %cst_19 = arith.constant dense<0.000000e+00> : vector<1xf32>
      %23 = vector.multi_reduction <add>, %22, %cst_19 [0] : vector<504x1xf32> to vector<1xf32>
      %24 = vector.shape_cast %23 : vector<1xf32> to vector<1x1xf32>
      %c0_20 = arith.constant 0 : index
      %c0_21 = arith.constant 0 : index
      %25 = vector.load %arg4[%c0_20, %c0_21] : memref<1x1xf32, #tpu.memory_space<vmem>>, vector<1x1xf32>
      tpu.vector_store %arg4[%c0_20, %c0_21], %24 {strides = array<i32>} : memref<1x1xf32, #tpu.memory_space<vmem>>, vector<1x1xf32>,
      %c0_22 = arith.constant 0 : index
      %c0_23 = arith.constant 0 : index
      %26 = vector.load %arg7[%c0_22, %c0_23] : memref<504x128xf32, #tpu.memory_space<vmem>>, vector<504x128xf32>
      %cst_24 = arith.constant dense<0.000000e+00> : vector<504xf32>
      %27 = vector.multi_reduction <add>, %26, %cst_24 [1] : vector<504x128xf32> to vector<504xf32>
      %28 = vector.shape_cast %27 : vector<504xf32> to vector<504x1xf32>
      %cst_25 = arith.constant dense<0.000000e+00> : vector<1xf32>
      %29 = vector.multi_reduction <add>, %28, %cst_25 [0] : vector<504x1xf32> to vector<1xf32>
      %30 = vector.shape_cast %29 : vector<1xf32> to vector<1x1xf32>
      %c0_26 = arith.constant 0 : index
      %c0_27 = arith.constant 0 : index
      %31 = vector.load %arg5[%c0_26, %c0_27] : memref<1x1xf32, #tpu.memory_space<vmem>>, vector<1x1xf32>
      tpu.vector_store %arg5[%c0_26, %c0_27], %30 {strides = array<i32>} : memref<1x1xf32, #tpu.memory_space<vmem>>, vector<1x1xf32>,
    } else {
    }
    return
  }
  func.func @transform_0(%arg0: i32) -> (i32, i32) {
    %c0_i32 = arith.constant 0 : i32
    %0 = arith.addi %c0_i32, %arg0 : i32
    %c0_i32_0 = arith.constant 0 : i32
    %c0_i32_1 = arith.constant 0 : i32
    return %0, %c0_i32_0 : i32, i32
  }
  func.func @transform_1(%arg0: i32) -> (i32, i32) {
    %c0_i32 = arith.constant 0 : i32
    %0 = arith.addi %c0_i32, %arg0 : i32
    %c0_i32_0 = arith.constant 0 : i32
    %c0_i32_1 = arith.constant 0 : i32
    return %0, %c0_i32_0 : i32, i32
  }
  func.func @transform_2(%arg0: i32) -> (i32, i32) {
    %c0_i32 = arith.constant 0 : i32
    %c0_i32_0 = arith.constant 0 : i32
    return %arg0, %c0_i32 : i32, i32
  }
  func.func @transform_3(%arg0: i32) -> (i32, i32) {
    %c0_i32 = arith.constant 0 : i32
    %c0_i32_0 = arith.constant 0 : i32
    %c0_i32_1 = arith.constant 0 : i32
    return %c0_i32, %c0_i32_0 : i32, i32
  }
  func.func @transform_4(%arg0: i32) -> (i32, i32) {
    %c0_i32 = arith.constant 0 : i32
    %c0_i32_0 = arith.constant 0 : i32
    %c0_i32_1 = arith.constant 0 : i32
    return %c0_i32, %c0_i32_0 : i32, i32
  }
}

</mosaic_0001>

<bundles_post_ra>
// kernel: tpu_custom_call.1
= control target key start
LH: loop header
LB: loop body
LE: loop exit
PB: predicated region body
PF: predicated region fallthrough
CT: control target
= control target key end

     0   :  { %10 = vsyncpa [#allocation5], 0  ;;  %s1752_s0 = inlined_call_operand.hbm [shape: f32[2016,128], index: 0, kind: input, shape index: {}]   ;;  %s1753_s1 = inlined_call_operand.hbm [shape: f32[2016,128], index: 1, kind: input, shape index: {}]   ;;  %s1754_s2 = inlined_call_operand.hbm [shape: f32[504,128], index: 2, kind: input, shape index: {}]   ;;  %s1755_s3 = inlined_call_operand.hbm [shape: f32[1,1], index: 3, kind: output, shape index: {0}]   ;;  %s1756_s4 = inlined_call_operand.hbm [shape: f32[1,1], index: 4, kind: output, shape index: {1}]  }
   0x1   :  { %11 = vsyncpa [#allocation8], 0 }
   0x2   :  { %12 = vsyncpa [#allocation6], 0 }
   0x3   :  { %13 = vsyncpa [#allocation12], 0  ;;  %s31_s17 = sshll.u32 %s1753_s1, 4  ;;  %s1703_s18 = smov [#allocation7]   ;;  %s32_s17 = int_to_ptr.hbm [resolvable:$true] %s31_s17 }
   0x4   :  { %s33_s19 = sshll.u32 %s1703_s18, 4  ;;  %s18_s22 = sshll.u32 %s1752_s0, 4  ;;  %s34_s19 = int_to_ptr.vmem [resolvable:$true] %s33_s19  ;;  %s19_s22 = int_to_ptr.hbm [resolvable:$true] %s18_s22 }
   0x5   :  { %s1704_s23 = smov 128   ;;  %s1705_s24 = smov 8  }
   0x6   :  { %39 = dma.hbm_to_vmem [thread:$0]  %s32_s17, 8064, %s34_s19, [#allocation8], %s1704_s23, %s1704_s23, %s1705_s24  }
   0x7   :  { %s1706_s25 = smov [#allocation4]   ;;  %s44_s29 = sshll.u32 %s1754_s2, 4  ;;  %s45_s29 = int_to_ptr.hbm [resolvable:$true] %s44_s29 }
   0x8   :  { %s20_s26 = sshll.u32 %s1706_s25, 4  ;;  %s1707_s1 = smov [#allocation9]   ;;  %s21_s26 = int_to_ptr.vmem [resolvable:$true] %s20_s26 }
   0x9   :  { %26 = dma.hbm_to_vmem [thread:$0]  %s19_s22, 8064, %s21_s26, [#allocation5], %s1704_s23, %s1704_s23, %s1705_s24  }
   0xa   :  { %s46_s30 = sshll.u32 %s1707_s1, 4  ;;  %s47_s30 = int_to_ptr.vmem [resolvable:$true] %s46_s30 }
   0xb   :  { %52 = dma.hbm_to_vmem [thread:$0]  %s45_s29, 8064, %s47_s30, [#allocation8], %s1704_s23, %s1704_s23, %s1705_s24  }
   0xc   :  { %1695 = dma.done.wait [#allocation5], 8064  }
   0xd   :  { %1696 = vsyncadd [#allocation5], 4294959232 }
   0xe   :  { %1697 = dma.done.wait [#allocation8], 16128  }
   0xf   :  { %1698 = vsyncadd [#allocation8], 4294951168  ;;  %v197_v0 = vld [vmem:[#allocation4 + $0x10] sm:$0xff]  ;;  %v195_v1 = vld [vmem:[#allocation4] sm:$0xff]  ;;  %vm1274_vm0 = vcmask 0   ;;  %s1541_s5 = sshll.u32 %s1755_s3, 4  ;;  %s1542_s5 = int_to_ptr.hbm [resolvable:$true] %s1541_s5 }
  0x10   :  { %v199_v2 = vld [vmem:[#allocation4 + $0x20] sm:$0xff]  ;;  %v575_v3 = vmul.f32 %v197_v0, %v197_v0  ;;  %v573_v4 = vmul.f32 %v195_v1, %v195_v1  ;;  %v198_v6 = vld [vmem:[#allocation4 + $0x18] sm:$0xff]  ;;  %v196_v7 = vld [vmem:[#allocation4 + $0x8] sm:$0xff]  ;;  %s1708_s6 = smov [#allocation10]   ;;  %s1709_s3 = smov [#allocation11]  }
  0x11   :  { %v577_v5 = vmul.f32 %v199_v2, %v199_v2  ;;  %v200_v8 = vld [vmem:[#allocation4 + $0x28] sm:$0xff]  ;;  %v576_v9 = vmul.f32 %v198_v6, %v198_v6  ;;  %v574_v10 = vmul.f32 %v196_v7, %v196_v7  ;;  %v202_v12 = vld [vmem:[#allocation4 + $0x38] sm:$0xff]  ;;  %v201_v13 = vld [vmem:[#allocation4 + $0x30] sm:$0xff]  ;;  %s1539_s7 = sshll.u32 %s1708_s6, 4  ;;  %s1550_s8 = sshll.u32 %s1709_s3, 4  ;;  %s1540_s7 = int_to_ptr.vmem [resolvable:$true] %s1539_s7  ;;  %s1551_s8 = int_to_ptr.vmem [resolvable:$true] %s1550_s8 }
  0x12   :  { %1084 = vadd.xlane.f32.xlu1 %v575_v3  ;;  %1080 = vadd.xlane.f32.xlu0 %v573_v4  ;;  %v578_v11 = vmul.f32 %v200_v8, %v200_v8  ;;  %v203_v14 = vld [vmem:[#allocation4 + $0x40] sm:$0xff]  ;;  %v580_v15 = vmul.f32 %v202_v12, %v202_v12  ;;  %v579_v16 = vmul.f32 %v201_v13, %v201_v13  ;;  %v205_v18 = vld [vmem:[#allocation4 + $0x50] sm:$0xff]  ;;  %v204_v19 = vld [vmem:[#allocation4 + $0x48] sm:$0xff]  ;;  %s1552_s11 = sshll.u32 %s1756_s4, 4  ;;  %s1553_s11 = int_to_ptr.hbm [resolvable:$true] %s1552_s11 }
  0x13   :  { %1088 = vadd.xlane.f32.xlu2 %v577_v5  ;;  %v581_v17 = vmul.f32 %v203_v14, %v203_v14  ;;  %v206_v20 = vld [vmem:[#allocation4 + $0x58] sm:$0xff]  ;;  %v583_v21 = vmul.f32 %v205_v18, %v205_v18  ;;  %v582_v22 = vmul.f32 %v204_v19, %v204_v19  ;;  %v208_v24 = vld [vmem:[#allocation4 + $0x68] sm:$0xff]  ;;  %v207_v25 = vld [vmem:[#allocation4 + $0x60] sm:$0xff] }
  0x14   :  { %v584_v23 = vmul.f32 %v206_v20, %v206_v20  ;;  %v209_v26 = vld [vmem:[#allocation4 + $0x70] sm:$0xff]  ;;  %v586_v27 = vmul.f32 %v208_v24, %v208_v24  ;;  %v585_v28 = vmul.f32 %v207_v25, %v207_v25  ;;  %v211_v30 = vld [vmem:[#allocation4 + $0x80] sm:$0xff]  ;;  %v210_v31 = vld [vmem:[#allocation4 + $0x78] sm:$0xff] }
  0x15   :  { %v587_v29 = vmul.f32 %v209_v26, %v209_v26  ;;  %v212_v32 = vld [vmem:[#allocation4 + $0x88] sm:$0xff]  ;;  %v589_v33 = vmul.f32 %v211_v30, %v211_v30  ;;  %v588_v34 = vmul.f32 %v210_v31, %v210_v31  ;;  %v214_v36 = vld [vmem:[#allocation4 + $0x98] sm:$0xff]  ;;  %v213_v37 = vld [vmem:[#allocation4 + $0x90] sm:$0xff] }
  0x16   :  { %v590_v35 = vmul.f32 %v212_v32, %v212_v32  ;;  %v215_v38 = vld [vmem:[#allocation4 + $0xa0] sm:$0xff]  ;;  %v592_v39 = vmul.f32 %v214_v36, %v214_v36  ;;  %v591_v40 = vmul.f32 %v213_v37, %v213_v37  ;;  %v217_v42 = vld [vmem:[#allocation4 + $0xb0] sm:$0xff]  ;;  %v216_v43 = vld [vmem:[#allocation4 + $0xa8] sm:$0xff] }
  0x17   :  { %v593_v41 = vmul.f32 %v215_v38, %v215_v38  ;;  %v218_v44 = vld [vmem:[#allocation4 + $0xb8] sm:$0xff]  ;;  %v595_v45 = vmul.f32 %v217_v42, %v217_v42  ;;  %v594_v46 = vmul.f32 %v216_v43, %v216_v43  ;;  %v220_v48 = vld [vmem:[#allocation4 + $0xc8] sm:$0xff]  ;;  %v219_v49 = vld [vmem:[#allocation4 + $0xc0] sm:$0xff] }
  0x18   :  { %v596_v47 = vmul.f32 %v218_v44, %v218_v44  ;;  %v221_v50 = vld [vmem:[#allocation4 + $0xd0] sm:$0xff]  ;;  %v598_v51 = vmul.f32 %v220_v48, %v220_v48  ;;  %v597_v52 = vmul.f32 %v219_v49, %v219_v49  ;;  %v223_v54 = vld [vmem:[#allocation4 + $0xe0] sm:$0xff]  ;;  %v222_v55 = vld [vmem:[#allocation4 + $0xd8] sm:$0xff] }
  0x19   :  { %v599_v53 = vmul.f32 %v221_v50, %v221_v50  ;;  %v224_v56 = vld [vmem:[#allocation4 + $0xe8] sm:$0xff]  ;;  %v601_v57 = vmul.f32 %v223_v54, %v223_v54  ;;  %v600_v58 = vmul.f32 %v222_v55, %v222_v55  ;;  %v226_v60 = vld [vmem:[#allocation4 + $0xf8] sm:$0xff]  ;;  %v225_v61 = vld [vmem:[#allocation4 + $0xf0] sm:$0xff] }
  0x1a   :  { %1086 = vadd.xlane.f32.xlu1 %v576_v9  ;;  %1082 = vadd.xlane.f32.xlu0 %v574_v10  ;;  %v602_v59 = vmul.f32 %v224_v56, %v224_v56  ;;  %v227_v62 = vld [vmem:[#allocation4 + $0x100] sm:$0xff]  ;;  %v604_v63 = vmul.f32 %v226_v60, %v226_v60  ;;  %v603_v0 = vmul.f32 %v225_v61, %v225_v61  ;;  %v229_v2 = vld [vmem:[#allocation4 + $0x110] sm:$0xff]  ;;  %v228_v3 = vld [vmem:[#allocation4 + $0x108] sm:$0xff] }
  0x1b   :  { %1090 = vadd.xlane.f32.xlu2 %v578_v11  ;;  %v605_v1 = vmul.f32 %v227_v62, %v227_v62  ;;  %v230_v4 = vld [vmem:[#allocation4 + $0x118] sm:$0xff]  ;;  %v607_v5 = vmul.f32 %v229_v2, %v229_v2  ;;  %v606_v6 = vmul.f32 %v228_v3, %v228_v3  ;;  %v232_v8 = vld [vmem:[#allocation4 + $0x128] sm:$0xff]  ;;  %v231_v9 = vld [vmem:[#allocation4 + $0x120] sm:$0xff] }
  0x1c   :  { %v608_v7 = vmul.f32 %v230_v4, %v230_v4  ;;  %v233_v10 = vld [vmem:[#allocation4 + $0x130] sm:$0xff]  ;;  %v610_v11 = vmul.f32 %v232_v8, %v232_v8  ;;  %v609_v12 = vmul.f32 %v231_v9, %v231_v9  ;;  %v235_v14 = vld [vmem:[#allocation4 + $0x140] sm:$0xff]  ;;  %v238_v20 = vld [vmem:[#allocation4 + $0x158] sm:$0xff] }
  0x1d   :  { %v611_v13 = vmul.f32 %v233_v10, %v233_v10  ;;  %v241_v26 = vld [vmem:[#allocation4 + $0x170] sm:$0xff]  ;;  %v243_v36 = vld [vmem:[#allocation4 + $0x180] sm:$0xff]  ;;  %v246_v48 = vld [vmem:[#allocation4 + $0x198] sm:$0xff] }
  0x1e   :  { %v619_v32 = vmul.f32 %v241_v26, %v241_v26  ;;  %v245_v37 = vld [vmem:[#allocation4 + $0x190] sm:$0xff]  ;;  %v621_v43 = vmul.f32 %v243_v36, %v243_v36  ;;  %v248_v50 = vld [vmem:[#allocation4 + $0x1a8] sm:$0xff]  ;;  %v624_v56 = vmul.f32 %v246_v48, %v246_v48  ;;  %v250_v60 = vld [vmem:[#allocation4 + $0x1b8] sm:$0xff] }
  0x1f   :  { %v623_v44 = vmul.f32 %v245_v37, %v245_v37  ;;  %v249_v61 = vld [vmem:[#allocation4 + $0x1b0] sm:$0xff]  ;;  %v628_v4 = vmul.f32 %v250_v60, %v250_v60  ;;  %v252_v9 = vld [vmem:[#allocation4 + $0x1c8] sm:$0xff]  ;;  %v260_v26 = vld [vmem:[#allocation9 + $0x10] sm:$0xff] }
  0x20   :  { %v253_v8 = vld [vmem:[#allocation4 + $0x1d0] sm:$0xff]  ;;  %v384_v37 = vld [vmem:[#allocation7] sm:$0xff] }
  0x22   :  { %1094 = vadd.xlane.f32.xlu1 %v580_v15  ;;  %1092 = vadd.xlane.f32.xlu0 %v579_v16  ;;  %v234_v15 = vld [vmem:[#allocation4 + $0x138] sm:$0xff]  ;;  %v236_v16 = vld [vmem:[#allocation4 + $0x148] sm:$0xff] }
  0x23   :  { %1096 = vadd.xlane.f32.xlu2 %v581_v17  ;;  %v613_v17 = vmul.f32 %v235_v14, %v235_v14  ;;  %v612_v18 = vmul.f32 %v234_v15, %v234_v15  ;;  %v614_v19 = vmul.f32 %v236_v16, %v236_v16  ;;  %v631_v16 = vmul.f32 %v253_v8, %v253_v8 }
  0x2a   :  { %1100 = vadd.xlane.f32.xlu1 %v583_v21  ;;  %1098 = vadd.xlane.f32.xlu0 %v582_v22  ;;  %v237_v21 = vld [vmem:[#allocation4 + $0x150] sm:$0xff]  ;;  %v239_v22 = vld [vmem:[#allocation4 + $0x160] sm:$0xff] }
  0x2b   :  { %1102 = vadd.xlane.f32.xlu2 %v584_v23  ;;  %v616_v23 = vmul.f32 %v238_v20, %v238_v20  ;;  %v615_v24 = vmul.f32 %v237_v21, %v237_v21  ;;  %v617_v25 = vmul.f32 %v239_v22, %v239_v22  ;;  %v259_v20 = vld [vmem:[#allocation9 + $0x8] sm:$0xff]  ;;  %v256_v21 = vld [vmem:[#allocation4 + $0x1e8] sm:$0xff]  ;;  %v255_v22 = vld [vmem:[#allocation4 + $0x1e0] sm:$0xff] }
  0x32   :  { %1106 = vadd.xlane.f32.xlu1 %v586_v27  ;;  %1104 = vadd.xlane.f32.xlu0 %v585_v28  ;;  %v240_v27 = vld [vmem:[#allocation4 + $0x168] sm:$0xff]  ;;  %v242_v28 = vld [vmem:[#allocation4 + $0x178] sm:$0xff] }
  0x33   :  { %1108 = vadd.xlane.f32.xlu2 %v587_v29 }
  0x3a   :  { %1112 = vadd.xlane.f32.xlu1 %v589_v33  ;;  %1110 = vadd.xlane.f32.xlu0 %v588_v34  ;;  %v618_v33 = vmul.f32 %v240_v27, %v240_v27  ;;  %v620_v34 = vmul.f32 %v242_v28, %v242_v28 }
  0x3b   :  { %1114 = vadd.xlane.f32.xlu2 %v590_v35  ;;  %v244_v35 = vld [vmem:[#allocation4 + $0x188] sm:$0xff] }
  0x3c   :  { %v622_v42 = vmul.f32 %v244_v35, %v244_v35 }
  0x42   :  { %1118 = vadd.xlane.f32.xlu1 %v592_v39  ;;  %1116 = vadd.xlane.f32.xlu0 %v591_v40 }
  0x43   :  { %1120 = vadd.xlane.f32.xlu2 %v593_v41 }
  0x4a   :  { %1124 = vadd.xlane.f32.xlu1 %v595_v45  ;;  %1122 = vadd.xlane.f32.xlu0 %v594_v46 }
  0x4b   :  { %1126 = vadd.xlane.f32.xlu2 %v596_v47  ;;  %v247_v47 = vld [vmem:[#allocation4 + $0x1a0] sm:$0xff] }
  0x4c   :  { %v625_v55 = vmul.f32 %v247_v47, %v247_v47  ;;  %v263_v47 = vld [vmem:[#allocation9 + $0x28] sm:$0xff] }
  0x52   :  { %1130 = vadd.xlane.f32.xlu1 %v598_v51  ;;  %1128 = vadd.xlane.f32.xlu0 %v597_v52 }
  0x53   :  { %1132 = vadd.xlane.f32.xlu2 %v599_v53 }
  0x5a   :  { %1136 = vadd.xlane.f32.xlu1 %v601_v57  ;;  %1134 = vadd.xlane.f32.xlu0 %v600_v58  ;;  %v626_v57 = vmul.f32 %v248_v50, %v248_v50 }
  0x5b   :  { %1138 = vadd.xlane.f32.xlu2 %v602_v59 }
  0x62   :  { %1142 = vadd.xlane.f32.xlu1 %v604_v63  ;;  %1140 = vadd.xlane.f32.xlu0 %v603_v0  ;;  %v251_v63 = vld [vmem:[#allocation4 + $0x1c0] sm:$0xff] }
  0x63   :  { %1144 = vadd.xlane.f32.xlu2 %v605_v1 }
  0x6a   :  { %1148 = vadd.xlane.f32.xlu1 %v607_v5  ;;  %1146 = vadd.xlane.f32.xlu0 %v606_v6  ;;  %v627_v5 = vmul.f32 %v249_v61, %v249_v61  ;;  %v629_v6 = vmul.f32 %v251_v63, %v251_v63  ;;  %v389_v61 = vld [vmem:[#allocation7 + $0x28] sm:$0xff] }
  0x6b   :  { %1150 = vadd.xlane.f32.xlu2 %v608_v7 }
  0x72   :  { %1154 = vadd.xlane.f32.xlu1 %v610_v11  ;;  %1152 = vadd.xlane.f32.xlu0 %v609_v12  ;;  %v254_v11 = vld [vmem:[#allocation4 + $0x1d8] sm:$0xff] }
  0x73   :  { %1156 = vadd.xlane.f32.xlu2 %v611_v13 }
  0x7a   :  { %1160 = vadd.xlane.f32.xlu1 %v613_v17  ;;  %1158 = vadd.xlane.f32.xlu0 %v612_v18  ;;  %v630_v17 = vmul.f32 %v252_v9, %v252_v9  ;;  %v632_v18 = vmul.f32 %v254_v11, %v254_v11 }
  0x7b   :  { %1162 = vadd.xlane.f32.xlu2 %v614_v19 }
  0x82   :  { %1166 = vadd.xlane.f32.xlu1 %v616_v23  ;;  %1164 = vadd.xlane.f32.xlu0 %v615_v24  ;;  %v258_v23 = vld [vmem:[#allocation9] sm:$0xff] }
  0x83   :  { %1168 = vadd.xlane.f32.xlu2 %v617_v25  ;;  %v257_v25 = vld [vmem:[#allocation4 + $0x1f0] sm:$0xff]  ;;  %v321_v35 = vmul.f32 1e-09, %v258_v23  ;;  %v268_v23 = vld [vmem:[#allocation9 + $0x50] sm:$0xff] }
  0x84   :  { %v635_v36 = vmul.f32 %v257_v25, %v257_v25  ;;  %v269_v25 = vld [vmem:[#allocation9 + $0x58] sm:$0xff] }
  0x85   :  { %v1085_v29 = vpop.xlane.xlu1 %1084  ;;  %v1081_v30 = vpop.xlane.xlu0 %1080 }
  0x86   :  { %v1089_v31 = vpop.xlane.xlu2 %1088 }
  0x8a   :  { %1172 = vadd.xlane.f32.xlu1 %v619_v32  ;;  %1170 = vadd.xlane.f32.xlu0 %v618_v33  ;;  %v634_v32 = vmul.f32 %v256_v21, %v256_v21  ;;  %v633_v33 = vmul.f32 %v255_v22, %v255_v22  ;;  %v267_v22 = vld [vmem:[#allocation9 + $0x48] sm:$0xff] }
  0x8b   :  { %1174 = vadd.xlane.f32.xlu2 %v620_v34  ;;  %v385_v34 = vld [vmem:[#allocation7 + $0x8] sm:$0xff] }
  0x8d   :  { %v1087_v38 = vpop.xlane.xlu1 %1086  ;;  %v1083_v39 = vpop.xlane.xlu0 %1082 }
  0x8e   :  { %v1206_v40 = vadd.f32 %v1083_v39, %v1081_v30  ;;  %v1091_v41 = vpop.xlane.xlu2 %1090 }
  0x90   :  { %v1207_v45 = vadd.f32 %v1206_v40, %v1085_v29  ;;  %v322_v29 = vmul.f32 1e-09, %v259_v20  ;;  %v386_v40 = vld [vmem:[#allocation7 + $0x10] sm:$0xff] }
  0x92   :  { %v1208_v46 = vadd.f32 %v1207_v45, %v1087_v38  ;;  %1178 = vadd.xlane.f32.xlu1 %v622_v42  ;;  %1176 = vadd.xlane.f32.xlu0 %v621_v43  ;;  %v323_v38 = vmul.f32 1e-09, %v260_v26  ;;  %v447_v42 = vadd.f32 %v384_v37, %v321_v35  ;;  %v262_v45 = vld [vmem:[#allocation9 + $0x20] sm:$0xff]  ;;  %v393_v35 = vld [vmem:[#allocation7 + $0x48] sm:$0xff]  ;;  %v332_v37 = vmul.f32 1e-09, %v269_v25 }
  0x93   :  { %1180 = vadd.xlane.f32.xlu2 %v623_v44  ;;  %v261_v44 = vld [vmem:[#allocation9 + $0x18] sm:$0xff] }
  0x94   :  { %v1209_v49 = vadd.f32 %v1208_v46, %v1089_v31  ;;  %v449_v43 = vadd.f32 %v386_v40, %v323_v38 }
  0x95   :  { %v1095_v51 = vpop.xlane.xlu1 %1094  ;;  %v1093_v52 = vpop.xlane.xlu0 %1092 }
  0x96   :  { %v1210_v53 = vadd.f32 %v1209_v49, %v1091_v41  ;;  %v1097_v54 = vpop.xlane.xlu2 %1096  ;;  %v448_v41 = vadd.f32 %v385_v34, %v322_v29 }
  0x98   :  { %v1211_v58 = vadd.f32 %v1210_v53, %v1093_v52  ;;  %v826_v50 = vmul.f32 %v448_v41, %v448_v41  ;;  %v825_v53 = vmul.f32 %v447_v42, %v447_v42  ;;  %v270_v42 = vld [vmem:[#allocation9 + $0x60] sm:$0xff] }
  0x9a   :  { %v1212_v59 = vadd.f32 %v1211_v58, %v1095_v51  ;;  %1184 = vadd.xlane.f32.xlu1 %v625_v55  ;;  %1182 = vadd.xlane.f32.xlu0 %v624_v56  ;;  %v325_v55 = vmul.f32 1e-09, %v262_v45  ;;  %v827_v56 = vmul.f32 %v449_v43, %v449_v43  ;;  %v388_v58 = vld [vmem:[#allocation7 + $0x20] sm:$0xff] }
  0x9b   :  { %1186 = vadd.xlane.f32.xlu2 %v626_v57  ;;  %v387_v57 = vld [vmem:[#allocation7 + $0x18] sm:$0xff] }
  0x9c   :  { %v1213_v62 = vadd.f32 %v1212_v59, %v1097_v54  ;;  %v324_v54 = vmul.f32 1e-09, %v261_v44  ;;  %v326_v59 = vmul.f32 1e-09, %v263_v47  ;;  %v451_v63 = vadd.f32 %v388_v58, %v325_v55  ;;  %v271_v44 = vld [vmem:[#allocation9 + $0x68] sm:$0xff] }
  0x9d   :  { %v1101_v0 = vpop.xlane.xlu1 %1100  ;;  %v1099_v1 = vpop.xlane.xlu0 %1098  ;;  %v334_v55 = vmul.f32 1e-09, %v271_v44 }
  0x9e   :  { %v1214_v2 = vadd.f32 %v1213_v62, %v1099_v1  ;;  %v1103_v3 = vpop.xlane.xlu2 %1102  ;;  %v450_v62 = vadd.f32 %v387_v57, %v324_v54  ;;  %v452_v1 = vadd.f32 %v389_v61, %v326_v59  ;;  %v829_v11 = vmul.f32 %v451_v63, %v451_v63  ;;  %v396_v54 = vld [vmem:[#allocation7 + $0x60] sm:$0xff]  ;;  %v397_v57 = vld [vmem:[#allocation7 + $0x68] sm:$0xff] }
  0xa0   :  { %v1215_v7 = vadd.f32 %v1214_v2, %v1101_v0  ;;  %v264_v0 = vld [vmem:[#allocation9 + $0x30] sm:$0xff]  ;;  %v265_v2 = vld [vmem:[#allocation9 + $0x38] sm:$0xff] }
  0xa2   :  { %1190 = vadd.xlane.f32.xlu1 %v628_v4  ;;  %1188 = vadd.xlane.f32.xlu0 %v627_v5  ;;  %v1216_v10 = vadd.f32 %v1215_v7, %v1103_v3  ;;  %v266_v4 = vld [vmem:[#allocation9 + $0x40] sm:$0xff]  ;;  %v327_v7 = vmul.f32 1e-09, %v264_v0  ;;  %v273_v0 = vld [vmem:[#allocation9 + $0x78] sm:$0xff] }
  0xa3   :  { %1192 = vadd.xlane.f32.xlu2 %v629_v6 }
  0xa5   :  { %v1107_v12 = vpop.xlane.xlu1 %1106  ;;  %v1105_v13 = vpop.xlane.xlu0 %1104 }
  0xa6   :  { %v1217_v14 = vadd.f32 %v1216_v10, %v1105_v13  ;;  %v1109_v15 = vpop.xlane.xlu2 %1108  ;;  %v828_v10 = vmul.f32 %v450_v62, %v450_v62  ;;  %v328_v13 = vmul.f32 1e-09, %v265_v2  ;;  %v460_v62 = vadd.f32 %v397_v57, %v334_v55  ;;  %v405_v55 = vld [vmem:[#allocation7 + $0xa8] sm:$0xff] }
  0xa8   :  { %v1218_v19 = vadd.f32 %v1217_v14, %v1107_v12  ;;  %v390_v12 = vld [vmem:[#allocation7 + $0x30] sm:$0xff]  ;;  %v830_v14 = vmul.f32 %v452_v1, %v452_v1  ;;  %v274_v1 = vld [vmem:[#allocation9 + $0x80] sm:$0xff] }
  0xaa   :  { %1196 = vadd.xlane.f32.xlu1 %v631_v16  ;;  %1194 = vadd.xlane.f32.xlu0 %v630_v17  ;;  %v1219_v24 = vadd.f32 %v1218_v19, %v1109_v15  ;;  %v391_v15 = vld [vmem:[#allocation7 + $0x38] sm:$0xff]  ;;  %v329_v16 = vmul.f32 1e-09, %v266_v4  ;;  %v453_v19 = vadd.f32 %v390_v12, %v327_v7 }
  0xab   :  { %1198 = vadd.xlane.f32.xlu2 %v632_v18  ;;  %v392_v18 = vld [vmem:[#allocation7 + $0x40] sm:$0xff]  ;;  %v454_v20 = vadd.f32 %v391_v15, %v328_v13  ;;  %v399_v13 = vld [vmem:[#allocation7 + $0x78] sm:$0xff] }
  0xac   :  { %v455_v21 = vadd.f32 %v392_v18, %v329_v16 }
  0xad   :  { %v1113_v27 = vpop.xlane.xlu1 %1112  ;;  %v1111_v28 = vpop.xlane.xlu0 %1110 }
  0xae   :  { %v1220_v30 = vadd.f32 %v1219_v24, %v1111_v28  ;;  %v1115_v31 = vpop.xlane.xlu2 %1114  ;;  %v831_v28 = vmul.f32 %v453_v19, %v453_v19  ;;  %v833_v34 = vmul.f32 %v455_v21, %v455_v21 }
  0xb0   :  { %v1221_v39 = vadd.f32 %v1220_v30, %v1113_v27 }
  0xb2   :  { %1202 = vadd.xlane.f32.xlu1 %v634_v32  ;;  %1200 = vadd.xlane.f32.xlu0 %v633_v33  ;;  %v1222_v46 = vadd.f32 %v1221_v39, %v1115_v31  ;;  %v832_v31 = vmul.f32 %v454_v20, %v454_v20  ;;  %v330_v32 = vmul.f32 1e-09, %v267_v22  ;;  %v331_v33 = vmul.f32 1e-09, %v268_v23  ;;  %v395_v39 = vld [vmem:[#allocation7 + $0x58] sm:$0xff]  ;;  %v276_v20 = vld [vmem:[#allocation9 + $0x90] sm:$0xff] }
  0xb3   :  { %1204 = vadd.xlane.f32.xlu2 %v635_v36  ;;  %v394_v36 = vld [vmem:[#allocation7 + $0x50] sm:$0xff]  ;;  %v458_v43 = vadd.f32 %v395_v39, %v332_v37 }
  0xb4   :  { %v456_v40 = vadd.f32 %v393_v35, %v330_v32  ;;  %v457_v41 = vadd.f32 %v394_v36, %v331_v33  ;;  %v277_v22 = vld [vmem:[#allocation9 + $0x98] sm:$0xff]  ;;  %v403_v35 = vld [vmem:[#allocation7 + $0x98] sm:$0xff] }
  0xb5   :  { %v1119_v48 = vpop.xlane.xlu1 %1118  ;;  %v1117_v49 = vpop.xlane.xlu0 %1116  ;;  %v402_v32 = vld [vmem:[#allocation7 + $0x90] sm:$0xff]  ;;  %v340_v33 = vmul.f32 1e-09, %v277_v22 }
  0xb6   :  { %v1223_v51 = vadd.f32 %v1222_v46, %v1117_v49  ;;  %v1121_v52 = vpop.xlane.xlu2 %1120  ;;  %v272_v46 = vld [vmem:[#allocation9 + $0x70] sm:$0xff]  ;;  %v333_v49 = vmul.f32 1e-09, %v270_v42  ;;  %v279_v42 = vld [vmem:[#allocation9 + $0xa8] sm:$0xff] }
  0xb7   :  { %v335_v58 = vmul.f32 1e-09, %v272_v46 }
  0xb8   :  { %v1224_v60 = vadd.f32 %v1223_v51, %v1119_v48  ;;  %v459_v61 = vadd.f32 %v396_v54, %v333_v49 }
  0xba   :  { %1341 = vadd.xlane.f32.xlu1 %v826_v50  ;;  %1339 = vadd.xlane.f32.xlu0 %v825_v53  ;;  %v1225_v3 = vadd.f32 %v1224_v60, %v1121_v52  ;;  %v834_v52 = vmul.f32 %v456_v40, %v456_v40  ;;  %v835_v53 = vmul.f32 %v457_v41, %v457_v41  ;;  %v398_v60 = vld [vmem:[#allocation7 + $0x70] sm:$0xff] }
  0xbb   :  { %1343 = vadd.xlane.f32.xlu2 %v827_v56  ;;  %v836_v56 = vmul.f32 %v458_v43, %v458_v43  ;;  %v461_v63 = vadd.f32 %v398_v60, %v335_v58  ;;  %v466_v40 = vadd.f32 %v403_v35, %v340_v33  ;;  %v280_v43 = vld [vmem:[#allocation9 + $0xb0] sm:$0xff]  ;;  %v411_v33 = vld [vmem:[#allocation7 + $0xd8] sm:$0xff] }
  0xbd   :  { %v1125_v5 = vpop.xlane.xlu1 %1124  ;;  %v1123_v6 = vpop.xlane.xlu0 %1122  ;;  %v839_v12 = vmul.f32 %v461_v63, %v461_v63 }
  0xbe   :  { %v1226_v8 = vadd.f32 %v1225_v3, %v1123_v6  ;;  %v1127_v9 = vpop.xlane.xlu2 %1126  ;;  %v275_v3 = vld [vmem:[#allocation9 + $0x88] sm:$0xff]  ;;  %v837_v6 = vmul.f32 %v459_v61, %v459_v61 }
  0xbf   :  { %v338_v15 = vmul.f32 1e-09, %v275_v3 }
  0xc0   :  { %v1227_v17 = vadd.f32 %v1226_v8, %v1125_v5 }
  0xc2   :  { %1345 = vadd.xlane.f32.xlu0 %v828_v10  ;;  %1347 = vadd.xlane.f32.xlu1 %v829_v11  ;;  %v1228_v24 = vadd.f32 %v1227_v17, %v1127_v9  ;;  %v838_v9 = vmul.f32 %v460_v62, %v460_v62  ;;  %v336_v10 = vmul.f32 1e-09, %v273_v0  ;;  %v337_v11 = vmul.f32 1e-09, %v274_v1  ;;  %v401_v17 = vld [vmem:[#allocation7 + $0x88] sm:$0xff]  ;;  %v282_v62 = vld [vmem:[#allocation9 + $0xc0] sm:$0xff] }
  0xc3   :  { %1349 = vadd.xlane.f32.xlu2 %v830_v14  ;;  %v400_v14 = vld [vmem:[#allocation7 + $0x80] sm:$0xff]  ;;  %v464_v21 = vadd.f32 %v401_v17, %v338_v15 }
  0xc4   :  { %v462_v18 = vadd.f32 %v399_v13, %v336_v10  ;;  %v463_v19 = vadd.f32 %v400_v14, %v337_v11  ;;  %v283_v0 = vld [vmem:[#allocation9 + $0xc8] sm:$0xff]  ;;  %v409_v13 = vld [vmem:[#allocation7 + $0xc8] sm:$0xff] }
  0xc5   :  { %v1131_v26 = vpop.xlane.xlu1 %1130  ;;  %v1129_v27 = vpop.xlane.xlu0 %1128  ;;  %v408_v10 = vld [vmem:[#allocation7 + $0xc0] sm:$0xff]  ;;  %v346_v11 = vmul.f32 1e-09, %v283_v0 }
  0xc6   :  { %v1229_v29 = vadd.f32 %v1228_v24, %v1129_v27  ;;  %v1133_v30 = vpop.xlane.xlu2 %1132  ;;  %v278_v24 = vld [vmem:[#allocation9 + $0xa0] sm:$0xff]  ;;  %v339_v27 = vmul.f32 1e-09, %v276_v20  ;;  %v285_v20 = vld [vmem:[#allocation9 + $0xd8] sm:$0xff] }
  0xc7   :  { %v341_v36 = vmul.f32 1e-09, %v278_v24 }
  0xc8   :  { %v1230_v38 = vadd.f32 %v1229_v29, %v1131_v26  ;;  %v465_v39 = vadd.f32 %v402_v32, %v339_v27 }
  0xca   :  { %1351 = vadd.xlane.f32.xlu0 %v831_v28  ;;  %1353 = vadd.xlane.f32.xlu1 %v832_v31  ;;  %v1231_v45 = vadd.f32 %v1230_v38, %v1133_v30  ;;  %v840_v30 = vmul.f32 %v462_v18, %v462_v18  ;;  %v841_v31 = vmul.f32 %v463_v19, %v463_v19  ;;  %v404_v38 = vld [vmem:[#allocation7 + $0xa0] sm:$0xff] }
  0xcb   :  { %1355 = vadd.xlane.f32.xlu2 %v833_v34  ;;  %v842_v34 = vmul.f32 %v464_v21, %v464_v21  ;;  %v467_v41 = vadd.f32 %v404_v38, %v341_v36  ;;  %v472_v18 = vadd.f32 %v409_v13, %v346_v11  ;;  %v286_v21 = vld [vmem:[#allocation9 + $0xe0] sm:$0xff]  ;;  %v417_v11 = vld [vmem:[#allocation7 + $0x108] sm:$0xff] }
  0xcd   :  { %v1137_v47 = vpop.xlane.xlu1 %1136  ;;  %v1135_v48 = vpop.xlane.xlu0 %1134  ;;  %v845_v54 = vmul.f32 %v467_v41, %v467_v41 }
  0xce   :  { %v1232_v50 = vadd.f32 %v1231_v45, %v1135_v48  ;;  %v1139_v51 = vpop.xlane.xlu2 %1138  ;;  %v281_v45 = vld [vmem:[#allocation9 + $0xb8] sm:$0xff]  ;;  %v843_v48 = vmul.f32 %v465_v39, %v465_v39 }
  0xcf   :  { %v344_v57 = vmul.f32 1e-09, %v281_v45 }
  0xd0   :  { %v1233_v59 = vadd.f32 %v1232_v50, %v1137_v47 }
  0xd2   :  { %1357 = vadd.xlane.f32.xlu0 %v834_v52  ;;  %1359 = vadd.xlane.f32.xlu1 %v835_v53  ;;  %v1234_v2 = vadd.f32 %v1233_v59, %v1139_v51  ;;  %v844_v51 = vmul.f32 %v466_v40, %v466_v40  ;;  %v342_v52 = vmul.f32 1e-09, %v279_v42  ;;  %v343_v53 = vmul.f32 1e-09, %v280_v43  ;;  %v407_v59 = vld [vmem:[#allocation7 + $0xb8] sm:$0xff]  ;;  %v288_v40 = vld [vmem:[#allocation9 + $0xf0] sm:$0xff] }
  0xd3   :  { %1361 = vadd.xlane.f32.xlu2 %v836_v56  ;;  %v406_v56 = vld [vmem:[#allocation7 + $0xb0] sm:$0xff]  ;;  %v470_v63 = vadd.f32 %v407_v59, %v344_v57 }
  0xd4   :  { %v468_v60 = vadd.f32 %v405_v55, %v342_v52  ;;  %v469_v61 = vadd.f32 %v406_v56, %v343_v53  ;;  %v289_v42 = vld [vmem:[#allocation9 + $0xf8] sm:$0xff]  ;;  %v415_v55 = vld [vmem:[#allocation7 + $0xf8] sm:$0xff] }
  0xd5   :  { %v1143_v4 = vpop.xlane.xlu1 %1142  ;;  %v1141_v5 = vpop.xlane.xlu0 %1140  ;;  %v414_v52 = vld [vmem:[#allocation7 + $0xf0] sm:$0xff]  ;;  %v352_v53 = vmul.f32 1e-09, %v289_v42 }
  0xd6   :  { %v1235_v7 = vadd.f32 %v1234_v2, %v1141_v5  ;;  %v1145_v8 = vpop.xlane.xlu2 %1144  ;;  %v284_v2 = vld [vmem:[#allocation9 + $0xd0] sm:$0xff]  ;;  %v345_v5 = vmul.f32 1e-09, %v282_v62  ;;  %v291_v62 = vld [vmem:[#allocation9 + $0x108] sm:$0xff] }
  0xd7   :  { %v347_v14 = vmul.f32 1e-09, %v284_v2 }
  0xd8   :  { %v1236_v16 = vadd.f32 %v1235_v7, %v1143_v4  ;;  %v471_v17 = vadd.f32 %v408_v10, %v345_v5 }
  0xda   :  { %1363 = vadd.xlane.f32.xlu0 %v837_v6  ;;  %1365 = vadd.xlane.f32.xlu1 %v838_v9  ;;  %v1237_v23 = vadd.f32 %v1236_v16, %v1145_v8  ;;  %v846_v8 = vmul.f32 %v468_v60, %v468_v60  ;;  %v847_v9 = vmul.f32 %v469_v61, %v469_v61  ;;  %v410_v16 = vld [vmem:[#allocation7 + $0xd0] sm:$0xff] }
  0xdb   :  { %1367 = vadd.xlane.f32.xlu2 %v839_v12  ;;  %v848_v12 = vmul.f32 %v470_v63, %v470_v63  ;;  %v473_v19 = vadd.f32 %v410_v16, %v347_v14  ;;  %v478_v60 = vadd.f32 %v415_v55, %v352_v53  ;;  %v292_v63 = vld [vmem:[#allocation9 + $0x110] sm:$0xff]  ;;  %v423_v53 = vld [vmem:[#allocation7 + $0x138] sm:$0xff] }
  0xdd   :  { %v1149_v25 = vpop.xlane.xlu1 %1148  ;;  %v1147_v26 = vpop.xlane.xlu0 %1146  ;;  %v851_v32 = vmul.f32 %v473_v19, %v473_v19 }
  0xde   :  { %v1238_v28 = vadd.f32 %v1237_v23, %v1147_v26  ;;  %v1151_v29 = vpop.xlane.xlu2 %1150  ;;  %v287_v23 = vld [vmem:[#allocation9 + $0xe8] sm:$0xff]  ;;  %v849_v26 = vmul.f32 %v471_v17, %v471_v17 }
  0xdf   :  { %v350_v35 = vmul.f32 1e-09, %v287_v23 }
  0xe0   :  { %v1239_v37 = vadd.f32 %v1238_v28, %v1149_v25 }
  0xe2   :  { %1369 = vadd.xlane.f32.xlu0 %v840_v30  ;;  %1371 = vadd.xlane.f32.xlu1 %v841_v31  ;;  %v1240_v44 = vadd.f32 %v1239_v37, %v1151_v29  ;;  %v850_v29 = vmul.f32 %v472_v18, %v472_v18  ;;  %v348_v30 = vmul.f32 1e-09, %v285_v20  ;;  %v349_v31 = vmul.f32 1e-09, %v286_v21  ;;  %v413_v37 = vld [vmem:[#allocation7 + $0xe8] sm:$0xff]  ;;  %v294_v18 = vld [vmem:[#allocation9 + $0x120] sm:$0xff] }
  0xe3   :  { %1373 = vadd.xlane.f32.xlu2 %v842_v34  ;;  %v412_v34 = vld [vmem:[#allocation7 + $0xe0] sm:$0xff]  ;;  %v476_v41 = vadd.f32 %v413_v37, %v350_v35 }
  0xe4   :  { %v474_v38 = vadd.f32 %v411_v33, %v348_v30  ;;  %v475_v39 = vadd.f32 %v412_v34, %v349_v31  ;;  %v295_v20 = vld [vmem:[#allocation9 + $0x128] sm:$0xff]  ;;  %v421_v33 = vld [vmem:[#allocation7 + $0x128] sm:$0xff] }
  0xe5   :  { %v1155_v46 = vpop.xlane.xlu1 %1154  ;;  %v1153_v47 = vpop.xlane.xlu0 %1152  ;;  %v420_v30 = vld [vmem:[#allocation7 + $0x120] sm:$0xff]  ;;  %v358_v31 = vmul.f32 1e-09, %v295_v20 }
  0xe6   :  { %v1241_v49 = vadd.f32 %v1240_v44, %v1153_v47  ;;  %v1157_v50 = vpop.xlane.xlu2 %1156  ;;  %v290_v44 = vld [vmem:[#allocation9 + $0x100] sm:$0xff]  ;;  %v351_v47 = vmul.f32 1e-09, %v288_v40  ;;  %v297_v40 = vld [vmem:[#allocation9 + $0x138] sm:$0xff] }
  0xe7   :  { %v353_v56 = vmul.f32 1e-09, %v290_v44 }
  0xe8   :  { %v1242_v58 = vadd.f32 %v1241_v49, %v1155_v46  ;;  %v477_v59 = vadd.f32 %v414_v52, %v351_v47 }
  0xea   :  { %1375 = vadd.xlane.f32.xlu0 %v843_v48  ;;  %1377 = vadd.xlane.f32.xlu1 %v844_v51  ;;  %v1243_v1 = vadd.f32 %v1242_v58, %v1157_v50  ;;  %v852_v50 = vmul.f32 %v474_v38, %v474_v38  ;;  %v853_v51 = vmul.f32 %v475_v39, %v475_v39  ;;  %v416_v58 = vld [vmem:[#allocation7 + $0x100] sm:$0xff] }
  0xeb   :  { %1379 = vadd.xlane.f32.xlu2 %v845_v54  ;;  %v854_v54 = vmul.f32 %v476_v41, %v476_v41  ;;  %v479_v61 = vadd.f32 %v416_v58, %v353_v56  ;;  %v484_v38 = vadd.f32 %v421_v33, %v358_v31  ;;  %v298_v41 = vld [vmem:[#allocation9 + $0x140] sm:$0xff]  ;;  %v429_v31 = vld [vmem:[#allocation7 + $0x168] sm:$0xff] }
  0xed   :  { %v1161_v3 = vpop.xlane.xlu1 %1160  ;;  %v1159_v4 = vpop.xlane.xlu0 %1158  ;;  %v857_v10 = vmul.f32 %v479_v61, %v479_v61 }
  0xee   :  { %v1244_v6 = vadd.f32 %v1243_v1, %v1159_v4  ;;  %v1163_v7 = vpop.xlane.xlu2 %1162  ;;  %v293_v1 = vld [vmem:[#allocation9 + $0x118] sm:$0xff]  ;;  %v855_v4 = vmul.f32 %v477_v59, %v477_v59 }
  0xef   :  { %v356_v13 = vmul.f32 1e-09, %v293_v1 }
  0xf0   :  { %v1245_v15 = vadd.f32 %v1244_v6, %v1161_v3 }
  0xf2   :  { %1381 = vadd.xlane.f32.xlu0 %v846_v8  ;;  %1383 = vadd.xlane.f32.xlu1 %v847_v9  ;;  %v1246_v22 = vadd.f32 %v1245_v15, %v1163_v7  ;;  %v856_v7 = vmul.f32 %v478_v60, %v478_v60  ;;  %v354_v8 = vmul.f32 1e-09, %v291_v62  ;;  %v355_v9 = vmul.f32 1e-09, %v292_v63  ;;  %v419_v15 = vld [vmem:[#allocation7 + $0x118] sm:$0xff]  ;;  %v300_v60 = vld [vmem:[#allocation9 + $0x150] sm:$0xff] }
  0xf3   :  { %1385 = vadd.xlane.f32.xlu2 %v848_v12  ;;  %v418_v12 = vld [vmem:[#allocation7 + $0x110] sm:$0xff]  ;;  %v482_v19 = vadd.f32 %v419_v15, %v356_v13 }
  0xf4   :  { %v480_v16 = vadd.f32 %v417_v11, %v354_v8  ;;  %v481_v17 = vadd.f32 %v418_v12, %v355_v9  ;;  %v301_v62 = vld [vmem:[#allocation9 + $0x158] sm:$0xff]  ;;  %v427_v11 = vld [vmem:[#allocation7 + $0x158] sm:$0xff] }
  0xf5   :  { %v1167_v24 = vpop.xlane.xlu1 %1166  ;;  %v1165_v25 = vpop.xlane.xlu0 %1164  ;;  %v426_v8 = vld [vmem:[#allocation7 + $0x150] sm:$0xff]  ;;  %v364_v9 = vmul.f32 1e-09, %v301_v62 }
  0xf6   :  { %v1247_v27 = vadd.f32 %v1246_v22, %v1165_v25  ;;  %v1169_v28 = vpop.xlane.xlu2 %1168  ;;  %v296_v22 = vld [vmem:[#allocation9 + $0x130] sm:$0xff]  ;;  %v357_v25 = vmul.f32 1e-09, %v294_v18  ;;  %v303_v18 = vld [vmem:[#allocation9 + $0x168] sm:$0xff]  ;;  %v309_v62 = vld [vmem:[#allocation9 + $0x198] sm:$0xff] }
  0xf7   :  { %v359_v34 = vmul.f32 1e-09, %v296_v22 }
  0xf8   :  { %v1248_v36 = vadd.f32 %v1247_v27, %v1167_v24  ;;  %v483_v37 = vadd.f32 %v420_v30, %v357_v25 }
  0xfa   :  { %1387 = vadd.xlane.f32.xlu0 %v849_v26  ;;  %1389 = vadd.xlane.f32.xlu1 %v850_v29  ;;  %v1249_v43 = vadd.f32 %v1248_v36, %v1169_v28  ;;  %v858_v28 = vmul.f32 %v480_v16, %v480_v16  ;;  %v859_v29 = vmul.f32 %v481_v17, %v481_v17  ;;  %v422_v36 = vld [vmem:[#allocation7 + $0x130] sm:$0xff] }
  0xfb   :  { %1391 = vadd.xlane.f32.xlu2 %v851_v32  ;;  %v860_v32 = vmul.f32 %v482_v19, %v482_v19  ;;  %v485_v39 = vadd.f32 %v422_v36, %v359_v34  ;;  %v490_v16 = vadd.f32 %v427_v11, %v364_v9  ;;  %v304_v19 = vld [vmem:[#allocation9 + $0x170] sm:$0xff] }
  0xfd   :  { %v1173_v45 = vpop.xlane.xlu1 %1172  ;;  %v1171_v46 = vpop.xlane.xlu0 %1170  ;;  %v863_v52 = vmul.f32 %v485_v39, %v485_v39  ;;  %v306_v39 = vld [vmem:[#allocation9 + $0x180] sm:$0xff] }
  0xfe   :  { %v1250_v48 = vadd.f32 %v1249_v43, %v1171_v46  ;;  %v1175_v49 = vpop.xlane.xlu2 %1174  ;;  %v299_v43 = vld [vmem:[#allocation9 + $0x148] sm:$0xff]  ;;  %v861_v46 = vmul.f32 %v483_v37, %v483_v37 }
  0xff   :  { %v362_v55 = vmul.f32 1e-09, %v299_v43  ;;  %v308_v43 = vld [vmem:[#allocation9 + $0x190] sm:$0xff] }
 0x100   :  { %v1251_v57 = vadd.f32 %v1250_v48, %v1173_v45 }
 0x102   :  { %1393 = vadd.xlane.f32.xlu0 %v852_v50  ;;  %1395 = vadd.xlane.f32.xlu1 %v853_v51  ;;  %v1252_v0 = vadd.f32 %v1251_v57, %v1175_v49  ;;  %v862_v49 = vmul.f32 %v484_v38, %v484_v38  ;;  %v360_v50 = vmul.f32 1e-09, %v297_v40  ;;  %v361_v51 = vmul.f32 1e-09, %v298_v41  ;;  %v425_v57 = vld [vmem:[#allocation7 + $0x148] sm:$0xff]  ;;  %v307_v41 = vld [vmem:[#allocation9 + $0x188] sm:$0xff] }
 0x103   :  { %1397 = vadd.xlane.f32.xlu2 %v854_v54  ;;  %v424_v54 = vld [vmem:[#allocation7 + $0x140] sm:$0xff]  ;;  %v488_v61 = vadd.f32 %v425_v57, %v362_v55  ;;  %v371_v55 = vmul.f32 1e-09, %v308_v43 }
 0x104   :  { %v486_v58 = vadd.f32 %v423_v53, %v360_v50  ;;  %v487_v59 = vadd.f32 %v424_v54, %v361_v51  ;;  %v432_v51 = vld [vmem:[#allocation7 + $0x180] sm:$0xff]  ;;  %v433_v54 = vld [vmem:[#allocation7 + $0x188] sm:$0xff] }
 0x105   :  { %v1179_v2 = vpop.xlane.xlu1 %1178  ;;  %v1177_v3 = vpop.xlane.xlu0 %1176 }
 0x106   :  { %v1253_v5 = vadd.f32 %v1252_v0, %v1177_v3  ;;  %v1181_v6 = vpop.xlane.xlu2 %1180  ;;  %v302_v0 = vld [vmem:[#allocation9 + $0x160] sm:$0xff]  ;;  %v363_v3 = vmul.f32 1e-09, %v300_v60 }
 0x107   :  { %v365_v12 = vmul.f32 1e-09, %v302_v0  ;;  %v310_v0 = vld [vmem:[#allocation9 + $0x1a0] sm:$0xff] }
 0x108   :  { %v1254_v14 = vadd.f32 %v1253_v5, %v1179_v2  ;;  %v489_v15 = vadd.f32 %v426_v8, %v363_v3  ;;  %v311_v3 = vld [vmem:[#allocation9 + $0x1a8] sm:$0xff] }
 0x10a   :  { %1399 = vadd.xlane.f32.xlu0 %v855_v4  ;;  %1401 = vadd.xlane.f32.xlu1 %v856_v7  ;;  %v1255_v21 = vadd.f32 %v1254_v14, %v1181_v6  ;;  %v864_v6 = vmul.f32 %v486_v58, %v486_v58  ;;  %v865_v7 = vmul.f32 %v487_v59, %v487_v59  ;;  %v428_v14 = vld [vmem:[#allocation7 + $0x160] sm:$0xff]  ;;  %v434_v58 = vld [vmem:[#allocation7 + $0x190] sm:$0xff] }
 0x10b   :  { %1403 = vadd.xlane.f32.xlu2 %v857_v10  ;;  %v866_v10 = vmul.f32 %v488_v61, %v488_v61  ;;  %v491_v17 = vadd.f32 %v428_v14, %v365_v12  ;;  %v435_v12 = vld [vmem:[#allocation7 + $0x198] sm:$0xff] }
 0x10d   :  { %v1185_v23 = vpop.xlane.xlu1 %1184  ;;  %v1183_v24 = vpop.xlane.xlu0 %1182  ;;  %v869_v30 = vmul.f32 %v491_v17, %v491_v17 }
 0x10e   :  { %v1256_v26 = vadd.f32 %v1255_v21, %v1183_v24  ;;  %v1187_v27 = vpop.xlane.xlu2 %1186  ;;  %v305_v21 = vld [vmem:[#allocation9 + $0x178] sm:$0xff]  ;;  %v867_v24 = vmul.f32 %v489_v15, %v489_v15  ;;  %v436_v15 = vld [vmem:[#allocation7 + $0x1a0] sm:$0xff] }
 0x10f   :  { %v368_v33 = vmul.f32 1e-09, %v305_v21 }
 0x110   :  { %v1257_v35 = vadd.f32 %v1256_v26, %v1185_v23 }
 0x112   :  { %1405 = vadd.xlane.f32.xlu0 %v858_v28  ;;  %1407 = vadd.xlane.f32.xlu1 %v859_v29  ;;  %v1258_v42 = vadd.f32 %v1257_v35, %v1187_v27  ;;  %v868_v27 = vmul.f32 %v490_v16, %v490_v16  ;;  %v366_v28 = vmul.f32 1e-09, %v303_v18  ;;  %v367_v29 = vmul.f32 1e-09, %v304_v19  ;;  %v431_v35 = vld [vmem:[#allocation7 + $0x178] sm:$0xff]  ;;  %v437_v18 = vld [vmem:[#allocation7 + $0x1a8] sm:$0xff] }
 0x113   :  { %1409 = vadd.xlane.f32.xlu2 %v860_v32  ;;  %v430_v32 = vld [vmem:[#allocation7 + $0x170] sm:$0xff]  ;;  %v494_v40 = vadd.f32 %v431_v35, %v368_v33  ;;  %v374_v16 = vmul.f32 1e-09, %v311_v3  ;;  %v320_v3 = vld [vmem:[#allocation9 + $0x1f0] sm:$0xff] }
 0x114   :  { %v492_v37 = vadd.f32 %v429_v31, %v366_v28  ;;  %v493_v38 = vadd.f32 %v430_v32, %v367_v29  ;;  %v438_v35 = vld [vmem:[#allocation7 + $0x1b0] sm:$0xff] }
 0x115   :  { %v1191_v44 = vpop.xlane.xlu1 %1190  ;;  %v1189_v45 = vpop.xlane.xlu0 %1188  ;;  %v872_v53 = vmul.f32 %v494_v40, %v494_v40  ;;  %v500_v21 = vadd.f32 %v437_v18, %v374_v16 }
 0x116   :  { %v1259_v47 = vadd.f32 %v1258_v42, %v1189_v45  ;;  %v1193_v48 = vpop.xlane.xlu2 %1192  ;;  %v871_v50 = vmul.f32 %v493_v38, %v493_v38 }
 0x118   :  { %v1260_v56 = vadd.f32 %v1259_v47, %v1191_v44 }
 0x11a   :  { %1411 = vadd.xlane.f32.xlu0 %v861_v46  ;;  %1413 = vadd.xlane.f32.xlu1 %v862_v49  ;;  %v1261_v63 = vadd.f32 %v1260_v56, %v1193_v48  ;;  %v369_v46 = vmul.f32 1e-09, %v306_v39  ;;  %v870_v49 = vmul.f32 %v492_v37, %v492_v37  ;;  %v440_v39 = vld [vmem:[#allocation7 + $0x1c0] sm:$0xff] }
 0x11b   :  { %1415 = vadd.xlane.f32.xlu2 %v863_v52  ;;  %v370_v52 = vmul.f32 1e-09, %v307_v41 }
 0x11c   :  { %v495_v59 = vadd.f32 %v432_v51, %v369_v46  ;;  %v317_v46 = vld [vmem:[#allocation9 + $0x1d8] sm:$0xff] }
 0x11d   :  { %v1197_v1 = vpop.xlane.xlu1 %1196  ;;  %v1195_v2 = vpop.xlane.xlu0 %1194  ;;  %v496_v61 = vadd.f32 %v433_v54, %v370_v52  ;;  %v441_v54 = vld [vmem:[#allocation7 + $0x1c8] sm:$0xff] }
 0x11e   :  { %v1262_v4 = vadd.f32 %v1261_v63, %v1195_v2  ;;  %v1199_v5 = vpop.xlane.xlu2 %1198  ;;  %v497_v63 = vadd.f32 %v434_v58, %v371_v55  ;;  %v380_v58 = vmul.f32 1e-09, %v317_v46 }
 0x11f   :  { %v874_v11 = vmul.f32 %v496_v61, %v496_v61 }
 0x120   :  { %v1263_v13 = vadd.f32 %v1262_v4, %v1197_v1  ;;  %v875_v14 = vmul.f32 %v497_v63, %v497_v63 }
 0x122   :  { %1417 = vadd.xlane.f32.xlu0 %v864_v6  ;;  %1419 = vadd.xlane.f32.xlu1 %v865_v7  ;;  %v1264_v20 = vadd.f32 %v1263_v13, %v1199_v5  ;;  %v873_v6 = vmul.f32 %v495_v59, %v495_v59  ;;  %v372_v7 = vmul.f32 1e-09, %v309_v62  ;;  %v373_v13 = vmul.f32 1e-09, %v310_v0  ;;  %v318_v0 = vld [vmem:[#allocation9 + $0x1e0] sm:$0xff] }
 0x123   :  { %1421 = vadd.xlane.f32.xlu2 %v866_v10 }
 0x124   :  { %v498_v19 = vadd.f32 %v435_v12, %v372_v7 }
 0x125   :  { %v1203_v22 = vpop.xlane.xlu1 %1202  ;;  %v1201_v23 = vpop.xlane.xlu0 %1200 }
 0x126   :  { %v1265_v25 = vadd.f32 %v1264_v20, %v1201_v23  ;;  %v1205_v26 = vpop.xlane.xlu2 %1204  ;;  %v499_v20 = vadd.f32 %v436_v15, %v373_v13  ;;  %v313_v23 = vld [vmem:[#allocation9 + $0x1b8] sm:$0xff]  ;;  %v876_v28 = vmul.f32 %v498_v19, %v498_v19  ;;  %v444_v13 = vld [vmem:[#allocation7 + $0x1e0] sm:$0xff]  ;;  %v383_v15 = vmul.f32 1e-09, %v320_v3 }
 0x127   :  { %v376_v33 = vmul.f32 1e-09, %v313_v23 }
 0x128   :  { %v1266_v34 = vadd.f32 %v1265_v25, %v1203_v22  ;;  %v312_v22 = vld [vmem:[#allocation9 + $0x1b0] sm:$0xff]  ;;  %v314_v25 = vld [vmem:[#allocation9 + $0x1c0] sm:$0xff]  ;;  %v877_v31 = vmul.f32 %v499_v20, %v499_v20 }
 0x129   :  { %v375_v32 = vmul.f32 1e-09, %v312_v22  ;;  %v377_v37 = vmul.f32 1e-09, %v314_v25 }
 0x12a   :  { %v1267_v36 = vadd.f32 %v1266_v34, %v1205_v26  ;;  %1423 = vadd.xlane.f32.xlu0 %v867_v24  ;;  %1425 = vadd.xlane.f32.xlu1 %v868_v27  ;;  %v878_v34 = vmul.f32 %v500_v21, %v500_v21 }
 0x12b   :  { %1427 = vadd.xlane.f32.xlu2 %v869_v30  ;;  %v501_v40 = vadd.f32 %v438_v35, %v375_v32  ;;  %v503_v43 = vadd.f32 %v440_v39, %v377_v37 }
 0x12c   :  { %v1268_v42 = vrot.slane %v1267_v36, 4 }
 0x12d   :  { %v1342_v44 = vpop.xlane.xlu1 %1341  ;;  %v1340_v45 = vpop.xlane.xlu0 %1339  ;;  %v879_v52 = vmul.f32 %v501_v40, %v501_v40 }
 0x12e   :  { %v1269_v47 = vadd.f32 %v1268_v42, %v1267_v36  ;;  %v1344_v48 = vpop.xlane.xlu2 %1343  ;;  %v1465_v57 = vadd.f32 %v1342_v44, %v1340_v45  ;;  %v439_v36 = vld [vmem:[#allocation7 + $0x1b8] sm:$0xff]  ;;  %v315_v42 = vld [vmem:[#allocation9 + $0x1c8] sm:$0xff]  ;;  %v316_v44 = vld [vmem:[#allocation9 + $0x1d0] sm:$0xff] }
 0x12f   :  { %v502_v41 = vadd.f32 %v439_v36, %v376_v33  ;;  %v379_v55 = vmul.f32 1e-09, %v316_v44 }
 0x130   :  { %v1270_v56 = vrot.slane %v1269_v47, 2  ;;  %v1466_v2 = vadd.f32 %v1465_v57, %v1344_v48  ;;  %v442_v57 = vld [vmem:[#allocation7 + $0x1d0] sm:$0xff] }
 0x131   :  { %v505_v62 = vadd.f32 %v442_v57, %v379_v55 }
 0x132   :  { %v1271_v60 = vadd.f32 %v1270_v56, %v1269_v47  ;;  %1429 = vadd.xlane.f32.xlu0 %v870_v49  ;;  %1431 = vadd.xlane.f32.xlu1 %v871_v50  ;;  %v378_v49 = vmul.f32 1e-09, %v315_v42  ;;  %v881_v56 = vmul.f32 %v503_v43, %v503_v43 }
 0x133   :  { %1433 = vadd.xlane.f32.xlu2 %v872_v53  ;;  %v880_v53 = vmul.f32 %v502_v41, %v502_v41 }
 0x134   :  { %v1272_v1 = vrot.slane %v1271_v60, 1  ;;  %v504_v61 = vadd.f32 %v441_v54, %v378_v49 }
 0x135   :  { %v1346_v4 = vpop.xlane.xlu0 %1345  ;;  %v1348_v5 = vpop.xlane.xlu1 %1347 }
 0x136   :  { %v1273_v8 = vadd.f32 %v1272_v1, %v1271_v60  ;;  %v1467_v9 = vadd.f32 %v1466_v2, %v1346_v4  ;;  %v1350_v10 = vpop.xlane.xlu2 %1349  ;;  %v443_v60 = vld [vmem:[#allocation7 + $0x1d8] sm:$0xff]  ;;  %v319_v1 = vld [vmem:[#allocation9 + $0x1e8] sm:$0xff] }
 0x137   :  { %v506_v63 = vadd.f32 %v443_v60, %v380_v58 }
 0x138   :  { %v1468_v17 = vadd.f32 %v1467_v9, %v1348_v5  ;;  %1275 = vst.msk [vmem:[#allocation10] sm:$0x1] %vm1274_vm0, %v1273_v8  ;;  %v883_v9 = vmul.f32 %v505_v62, %v505_v62 }
 0x139   :  { %v884_v12 = vmul.f32 %v506_v63, %v506_v63  ;;  %1544 = dma.vmem_to_hbm [thread:$0]  %s1540_s7, 16, %s1542_s5, [#allocation6]  }
 0x13a   :  { %1435 = vadd.xlane.f32.xlu0 %v873_v6  ;;  %1437 = vadd.xlane.f32.xlu1 %v874_v11  ;;  %v1469_v24 = vadd.f32 %v1468_v17, %v1350_v10  ;;  %v882_v6 = vmul.f32 %v504_v61, %v504_v61  ;;  %v381_v10 = vmul.f32 1e-09, %v318_v0  ;;  %v382_v11 = vmul.f32 1e-09, %v319_v1  ;;  %v446_v17 = vld [vmem:[#allocation7 + $0x1f0] sm:$0xff] }
 0x13b   :  { %1439 = vadd.xlane.f32.xlu2 %v875_v14  ;;  %v445_v14 = vld [vmem:[#allocation7 + $0x1e8] sm:$0xff]  ;;  %v509_v20 = vadd.f32 %v446_v17, %v383_v15 }
 0x13c   :  { %v507_v18 = vadd.f32 %v444_v13, %v381_v10  ;;  %v508_v19 = vadd.f32 %v445_v14, %v382_v11 }
 0x13d   :  { %v1352_v26 = vpop.xlane.xlu0 %1351  ;;  %v1354_v27 = vpop.xlane.xlu1 %1353 }
 0x13e   :  { %v1470_v29 = vadd.f32 %v1469_v24, %v1352_v26  ;;  %v1356_v30 = vpop.xlane.xlu2 %1355  ;;  %v885_v26 = vmul.f32 %v507_v18, %v507_v18 }
 0x140   :  { %v1471_v38 = vadd.f32 %v1470_v29, %v1354_v27  ;;  %v886_v27 = vmul.f32 %v508_v19, %v508_v19 }
 0x142   :  { %1441 = vadd.xlane.f32.xlu0 %v876_v28  ;;  %1443 = vadd.xlane.f32.xlu1 %v877_v31  ;;  %v1472_v45 = vadd.f32 %v1471_v38, %v1356_v30  ;;  %v887_v28 = vmul.f32 %v509_v20, %v509_v20 }
 0x143   :  { %1445 = vadd.xlane.f32.xlu2 %v878_v34 }
 0x145   :  { %v1358_v47 = vpop.xlane.xlu0 %1357  ;;  %v1360_v48 = vpop.xlane.xlu1 %1359 }
 0x146   :  { %v1473_v50 = vadd.f32 %v1472_v45, %v1358_v47  ;;  %v1362_v51 = vpop.xlane.xlu2 %1361 }
 0x148   :  { %v1474_v59 = vadd.f32 %v1473_v50, %v1360_v48 }
 0x14a   :  { %1447 = vadd.xlane.f32.xlu0 %v879_v52  ;;  %1449 = vadd.xlane.f32.xlu1 %v880_v53  ;;  %v1475_v2 = vadd.f32 %v1474_v59, %v1362_v51 }
 0x14b   :  { %1451 = vadd.xlane.f32.xlu2 %v881_v56 }
 0x14d   :  { %v1364_v4 = vpop.xlane.xlu0 %1363  ;;  %v1366_v5 = vpop.xlane.xlu1 %1365 }
 0x14e   :  { %v1476_v7 = vadd.f32 %v1475_v2, %v1364_v4  ;;  %v1368_v8 = vpop.xlane.xlu2 %1367 }
 0x150   :  { %v1477_v16 = vadd.f32 %v1476_v7, %v1366_v5 }
 0x152   :  { %1453 = vadd.xlane.f32.xlu0 %v882_v6  ;;  %1455 = vadd.xlane.f32.xlu1 %v883_v9  ;;  %v1478_v21 = vadd.f32 %v1477_v16, %v1368_v8 }
 0x153   :  { %1457 = vadd.xlane.f32.xlu2 %v884_v12 }
 0x155   :  { %v1370_v22 = vpop.xlane.xlu0 %1369  ;;  %v1372_v23 = vpop.xlane.xlu1 %1371 }
 0x156   :  { %v1479_v24 = vadd.f32 %v1478_v21, %v1370_v22  ;;  %v1374_v25 = vpop.xlane.xlu2 %1373 }
 0x158   :  { %v1480_v29 = vadd.f32 %v1479_v24, %v1372_v23 }
 0x15a   :  { %1459 = vadd.xlane.f32.xlu0 %v885_v26  ;;  %1461 = vadd.xlane.f32.xlu1 %v886_v27  ;;  %v1481_v30 = vadd.f32 %v1480_v29, %v1374_v25 }
 0x15b   :  { %1463 = vadd.xlane.f32.xlu2 %v887_v28 }
 0x15d   :  { %v1376_v31 = vpop.xlane.xlu0 %1375  ;;  %v1378_v32 = vpop.xlane.xlu1 %1377 }
 0x15e   :  { %v1482_v33 = vadd.f32 %v1481_v30, %v1376_v31  ;;  %v1380_v34 = vpop.xlane.xlu2 %1379 }
 0x160   :  { %v1483_v35 = vadd.f32 %v1482_v33, %v1378_v32 }
 0x162   :  { %v1484_v36 = vadd.f32 %v1483_v35, %v1380_v34 }
 0x165   :  { %v1382_v37 = vpop.xlane.xlu0 %1381  ;;  %v1384_v38 = vpop.xlane.xlu1 %1383 }
 0x166   :  { %v1485_v39 = vadd.f32 %v1484_v36, %v1382_v37  ;;  %v1386_v40 = vpop.xlane.xlu2 %1385 }
 0x168   :  { %v1486_v41 = vadd.f32 %v1485_v39, %v1384_v38 }
 0x16a   :  { %v1487_v42 = vadd.f32 %v1486_v41, %v1386_v40 }
 0x16d   :  { %v1388_v43 = vpop.xlane.xlu0 %1387  ;;  %v1390_v44 = vpop.xlane.xlu1 %1389 }
 0x16e   :  { %v1488_v45 = vadd.f32 %v1487_v42, %v1388_v43  ;;  %v1392_v46 = vpop.xlane.xlu2 %1391 }
 0x170   :  { %v1489_v47 = vadd.f32 %v1488_v45, %v1390_v44 }
 0x172   :  { %v1490_v48 = vadd.f32 %v1489_v47, %v1392_v46 }
 0x175   :  { %v1394_v49 = vpop.xlane.xlu0 %1393  ;;  %v1396_v50 = vpop.xlane.xlu1 %1395 }
 0x176   :  { %v1491_v51 = vadd.f32 %v1490_v48, %v1394_v49  ;;  %v1398_v52 = vpop.xlane.xlu2 %1397 }
 0x178   :  { %v1492_v53 = vadd.f32 %v1491_v51, %v1396_v50 }
 0x17a   :  { %v1493_v54 = vadd.f32 %v1492_v53, %v1398_v52 }
 0x17d   :  { %v1400_v55 = vpop.xlane.xlu0 %1399  ;;  %v1402_v56 = vpop.xlane.xlu1 %1401 }
 0x17e   :  { %v1494_v57 = vadd.f32 %v1493_v54, %v1400_v55  ;;  %v1404_v58 = vpop.xlane.xlu2 %1403 }
 0x180   :  { %v1495_v59 = vadd.f32 %v1494_v57, %v1402_v56 }
 0x182   :  { %v1496_v60 = vadd.f32 %v1495_v59, %v1404_v58 }
 0x185   :  { %v1406_v61 = vpop.xlane.xlu0 %1405  ;;  %v1408_v62 = vpop.xlane.xlu1 %1407 }
 0x186   :  { %v1497_v63 = vadd.f32 %v1496_v60, %v1406_v61  ;;  %v1410_v0 = vpop.xlane.xlu2 %1409 }
 0x188   :  { %v1498_v1 = vadd.f32 %v1497_v63, %v1408_v62 }
 0x18a   :  { %v1499_v2 = vadd.f32 %v1498_v1, %v1410_v0 }
 0x18d   :  { %v1412_v3 = vpop.xlane.xlu0 %1411  ;;  %v1414_v4 = vpop.xlane.xlu1 %1413 }
 0x18e   :  { %v1500_v5 = vadd.f32 %v1499_v2, %v1412_v3  ;;  %v1416_v6 = vpop.xlane.xlu2 %1415 }
 0x190   :  { %v1501_v7 = vadd.f32 %v1500_v5, %v1414_v4 }
 0x192   :  { %v1502_v8 = vadd.f32 %v1501_v7, %v1416_v6 }
 0x195   :  { %v1418_v9 = vpop.xlane.xlu0 %1417  ;;  %v1420_v10 = vpop.xlane.xlu1 %1419 }
 0x196   :  { %v1503_v11 = vadd.f32 %v1502_v8, %v1418_v9  ;;  %v1422_v12 = vpop.xlane.xlu2 %1421 }
 0x198   :  { %v1504_v13 = vadd.f32 %v1503_v11, %v1420_v10 }
 0x19a   :  { %v1505_v14 = vadd.f32 %v1504_v13, %v1422_v12 }
 0x19d   :  { %v1424_v15 = vpop.xlane.xlu0 %1423  ;;  %v1426_v16 = vpop.xlane.xlu1 %1425 }
 0x19e   :  { %v1506_v17 = vadd.f32 %v1505_v14, %v1424_v15  ;;  %v1428_v18 = vpop.xlane.xlu2 %1427 }
 0x1a0   :  { %v1507_v19 = vadd.f32 %v1506_v17, %v1426_v16 }
 0x1a2   :  { %v1508_v20 = vadd.f32 %v1507_v19, %v1428_v18 }
 0x1a5   :  { %v1430_v21 = vpop.xlane.xlu0 %1429  ;;  %v1432_v22 = vpop.xlane.xlu1 %1431 }
 0x1a6   :  { %v1509_v23 = vadd.f32 %v1508_v20, %v1430_v21  ;;  %v1434_v24 = vpop.xlane.xlu2 %1433 }
 0x1a8   :  { %v1510_v25 = vadd.f32 %v1509_v23, %v1432_v22 }
 0x1aa   :  { %v1511_v26 = vadd.f32 %v1510_v25, %v1434_v24 }
 0x1ad   :  { %v1436_v27 = vpop.xlane.xlu0 %1435  ;;  %v1438_v28 = vpop.xlane.xlu1 %1437 }
 0x1ae   :  { %v1512_v29 = vadd.f32 %v1511_v26, %v1436_v27  ;;  %v1440_v30 = vpop.xlane.xlu2 %1439 }
 0x1b0   :  { %v1513_v31 = vadd.f32 %v1512_v29, %v1438_v28 }
 0x1b2   :  { %v1514_v32 = vadd.f32 %v1513_v31, %v1440_v30 }
 0x1b5   :  { %v1442_v33 = vpop.xlane.xlu0 %1441  ;;  %v1444_v34 = vpop.xlane.xlu1 %1443 }
 0x1b6   :  { %v1515_v35 = vadd.f32 %v1514_v32, %v1442_v33  ;;  %v1446_v36 = vpop.xlane.xlu2 %1445 }
 0x1b8   :  { %v1516_v37 = vadd.f32 %v1515_v35, %v1444_v34 }
 0x1ba   :  { %v1517_v38 = vadd.f32 %v1516_v37, %v1446_v36 }
 0x1bd   :  { %v1448_v39 = vpop.xlane.xlu0 %1447  ;;  %v1450_v40 = vpop.xlane.xlu1 %1449 }
 0x1be   :  { %v1518_v41 = vadd.f32 %v1517_v38, %v1448_v39  ;;  %v1452_v42 = vpop.xlane.xlu2 %1451 }
 0x1c0   :  { %v1519_v43 = vadd.f32 %v1518_v41, %v1450_v40 }
 0x1c2   :  { %v1520_v44 = vadd.f32 %v1519_v43, %v1452_v42 }
 0x1c5   :  { %v1454_v45 = vpop.xlane.xlu0 %1453  ;;  %v1456_v46 = vpop.xlane.xlu1 %1455 }
 0x1c6   :  { %v1521_v47 = vadd.f32 %v1520_v44, %v1454_v45  ;;  %v1458_v48 = vpop.xlane.xlu2 %1457 }
 0x1c8   :  { %v1522_v49 = vadd.f32 %v1521_v47, %v1456_v46 }
 0x1ca   :  { %v1523_v50 = vadd.f32 %v1522_v49, %v1458_v48 }
 0x1cd   :  { %v1460_v51 = vpop.xlane.xlu0 %1459  ;;  %v1462_v52 = vpop.xlane.xlu1 %1461 }
 0x1ce   :  { %v1524_v53 = vadd.f32 %v1523_v50, %v1460_v51  ;;  %v1464_v54 = vpop.xlane.xlu2 %1463 }
 0x1d0   :  { %v1525_v55 = vadd.f32 %v1524_v53, %v1462_v52 }
 0x1d2   :  { %v1526_v56 = vadd.f32 %v1525_v55, %v1464_v54 }
 0x1d4   :  { %v1527_v57 = vrot.slane %v1526_v56, 4 }
 0x1d6   :  { %v1528_v58 = vadd.f32 %v1527_v57, %v1526_v56 }
 0x1d8   :  { %v1529_v59 = vrot.slane %v1528_v58, 2 }
 0x1da   :  { %v1530_v60 = vadd.f32 %v1529_v59, %v1528_v58 }
 0x1dc   :  { %v1531_v61 = vrot.slane %v1530_v60, 1 }
 0x1de   :  { %v1532_v62 = vadd.f32 %v1531_v61, %v1530_v60 }
 0x1e0   :  { %1533 = vst.msk [vmem:[#allocation11] sm:$0x1] %vm1274_vm0, %v1532_v62 }
 0x1e1   :  { %1555 = dma.vmem_to_hbm [thread:$0]  %s1551_s8, 16, %s1553_s11, [#allocation12]  }
 0x1e2   :  { %1699 = dma.done.wait [#allocation6], 16  }
 0x1e3   :  { %1700 = vsyncadd [#allocation6], 4294967280 }
 0x1e4   :  { %1701 = dma.done.wait [#allocation12], 16  }
 0x1e5   :  { %1702 = vsyncadd [#allocation12], 4294967280 }
 0x1e6   :  { %1564 = vsyncpa [#allocation5], 1 }
 0x1e7   :  { %1565 = vsyncpa [#allocation8], 1 }
 0x1e8   :  { %1566 = vsyncpa [#allocation6], 1 }
 0x1e9   :  { %1567 = vsyncpa [#allocation12], 1 }

</bundles_post_ra>
